<compile_context>
chip_gen: v7x
topology: tpu7x:2x2x1
jax: 0.10.0
libtpu: 0.0.40
codegen_flags: <defaults>
</compile_context>

<pallas_src>
import functools

import jax
import jax.numpy as jnp
from jax.experimental import pallas as pl
from jax.experimental.pallas import tpu as pltpu


def _cdiv(a, b):
    return (a + b - 1) // b


def _round_up(a, b):
    return _cdiv(a, b) * b


def _nested_gate_kernel(u_ref, g_ref, *, ncomponents, lane_tile):
    """Count-from-u + nested 0/1 gate matrix for one (batch, lane) tile.

    u_ref: (tb, 1)   float32 control values in [0, 1]
    g_ref: (tb, tn)  gate tile; tn is either the full component dim (small n)
                     or a 128-multiple lane tile (large n, second grid axis)
    """
    u = u_ref[...]                                                # (tb, 1)
    nf = jnp.float32(ncomponents)
    # count(u): c[b] = clamp(round(u[b] * n), 0, n); convert only the (tb,1)
    # count to int32 (cheap) and compare against an int32 iota (no per-vreg
    # int->f32 convert on the wide output tile).
    c = jnp.clip(jnp.round(u * nf), 0.0, nf).astype(jnp.int32)   # (tb, 1)
    base = pl.program_id(1) * lane_tile                          # global column offset
    col = jax.lax.broadcasted_iota(jnp.int32, g_ref.shape, 1) + base
    # gate_matrix_from_count (nested): g[b, j] = 1 iff j < c[b]
    g_ref[...] = (col < c).astype(g_ref.dtype)


def nested_count_from_u_gate(x, u, ncomponents, *, force_pallas=False):
    """JAX/Pallas equivalent of NestedCountFromUGate.forward.

    x: [B, ...]  only batch size / dtype are consumed, as in the module
    u: [B]       control signal (set via set_control in the PyTorch module)
    returns g: [B, ncomponents] with g[b, j] = 1 if j < count(u[b]) else 0
    """
    batch = x.shape[0]
    n = ncomponents
    out_dtype = x.dtype

    # Tiny-shape fast path: at module-scale sizes the gate is a handful of
    # vregs; a fused XLA expression beats a pallas_call launch by microseconds
    # and fuses into whatever consumes g.
    if not force_pallas and batch * max(n, 1) <= 32768:
        c = jnp.clip(jnp.round(u.astype(jnp.float32) * n), 0, n).astype(jnp.int32)
        col = jnp.arange(n, dtype=jnp.int32)[None, :]
        return (col < c[:, None]).astype(out_dtype)

    itemsize = jnp.dtype(out_dtype).itemsize
    # Sublane multiple for the output dtype (f32:8, bf16:16, int8/fp8:32).
    sub = {4: 8, 2: 16, 1: 32}.get(itemsize, 8)

    # Lane (component) tiling: keep the full width when it is modest (the
    # block equal to the full array dim is always legal, no padding, no slice);
    # tile in 8192-lane chunks (multiple of 128) only when n is very wide so
    # the per-tile VMEM stays bounded on v7x (64 MiB physical).
    LANE_TILE = 8192
    tn = n if n <= LANE_TILE else LANE_TILE

    # Batch tile: budget double-buffered output tile + double-buffered u tile
    # ((tb,1) f32 occupies 128 padded lanes = 512 B/row in VMEM) against a
    # conservative 16 MiB, well inside every generation's scoped default.
    budget = 16 * 1024 * 1024
    per_row = 2 * (tn * itemsize + 128 * 4)
    tb_cap = max(sub, (budget // per_row) // sub * sub)

    if batch <= tb_cap:
        if batch >= 4 * sub:
            # Keep >= 2 batch steps so both v7x TensorCores get work.
            tb = _round_up(_cdiv(batch, 2), sub)
        else:
            tb = batch          # full-dim block: legal for any batch size
    else:
        tb = tb_cap             # multiple of sub; ragged last block is masked

    grid = (_cdiv(batch, tb), _cdiv(n, tn))

    u2 = u.reshape(batch, 1).astype(jnp.float32)   # no padding; ragged handled by Pallas

    kernel = functools.partial(_nested_gate_kernel, ncomponents=n, lane_tile=tn)
    return pl.pallas_call(
        kernel,
        out_shape=jax.ShapeDtypeStruct((batch, n), out_dtype),
        grid=grid,
        in_specs=[pl.BlockSpec((tb, 1), lambda i, j: (i, 0))],
        out_specs=pl.BlockSpec((tb, tn), lambda i, j: (i, j)),
        compiler_params=pltpu.CompilerParams(
            dimension_semantics=("parallel", "parallel")),
    )(u2)


def _reference(x, u, ncomponents):
    """Pure-JAX reference for the same semantics."""
    n = ncomponents
    c = jnp.clip(jnp.round(u.astype(jnp.float32) * n), 0, n)            # (B,)
    col = jnp.arange(n, dtype=jnp.float32)[None, :]                     # (1, n)
    return (col < c[:, None]).astype(x.dtype)                           # (B, n)


if __name__ == "__main__":
    key = jax.random.PRNGKey(0)
    kx, ku, kx2, ku2 = jax.random.split(key, 4)

    # Case 1: module-scale shapes (NCHW input, tiny gate). Force the Pallas
    # path so the kernel itself is exercised (default would take the fused
    # fast path at this size).
    B, C, H, W = 2, 4, 16, 16
    ncomponents = 8
    x = jax.random.normal(kx, (B, C, H, W), dtype=jnp.float32)   # NCHW
    u = jax.random.uniform(ku, (B,), dtype=jnp.float32)          # control in [0, 1)

    g = nested_count_from_u_gate(x, u, ncomponents, force_pallas=True)
    g = jax.block_until_ready(g)
    g_ref = _reference(x, u, ncomponents)
    assert g.shape == (B, ncomponents)
    assert g.dtype == x.dtype
    assert jnp.allclose(g, g_ref), (g, g_ref)

    # Case 2: ragged batch / bf16 sublane-packing / non-128 lane width,
    # still through the Pallas path.
    B2, n2 = 33, 200
    x2 = jax.random.normal(kx2, (B2, C, H, W), dtype=jnp.bfloat16)
    u2 = jax.random.uniform(ku2, (B2,), dtype=jnp.float32)

    g2 = nested_count_from_u_gate(x2, u2, n2, force_pallas=True)
    g2 = jax.block_until_ready(g2)
    g2_ref = _reference(x2, u2, n2)
    assert g2.shape == (B2, n2)
    assert g2.dtype == x2.dtype
    assert jnp.allclose(g2.astype(jnp.float32), g2_ref.astype(jnp.float32)), (g2, g2_ref)

    # Case 3: default (auto) path — tiny shapes take the fused pure-JAX
    # expression; verify it matches the reference too.
    g3 = jax.block_until_ready(nested_count_from_u_gate(x, u, ncomponents))
    assert g3.shape == (B, ncomponents) and g3.dtype == x.dtype
    assert jnp.allclose(g3, g_ref)

    print("KERNEL_OK")
</pallas_src>

<mosaic_0001>
module attributes {stable_mosaic.version = 11 : i64} {
  func.func @_nested_gate_kernel(%arg0: i32, %arg1: i32, %arg2: memref<2x1xf32, #tpu.memory_space<vmem>>, %arg3: memref<2x8xf32, #tpu.memory_space<vmem>>) attributes {dimension_semantics = [#tpu.dimension_semantics<parallel>, #tpu.dimension_semantics<parallel>], iteration_bounds = array<i64: 1, 1>, scalar_prefetch = 0 : i64, scratch_operands = 0 : i64, tpu.core_type = #tpu.core_type<tc>, window_params = [{transform_indices = @transform_0, window_bounds = array<i64: 2, 1>}, {transform_indices = @transform_1, window_bounds = array<i64: 2, 8>}]} {
    %c0 = arith.constant 0 : index
    %c0_0 = arith.constant 0 : index
    %0 = vector.load %arg2[%c0, %c0_0] : memref<2x1xf32, #tpu.memory_space<vmem>>, vector<2x1xf32>
    %cst = arith.constant 8.000000e+00 : f32
    %1 = vector.broadcast %cst : f32 to vector<2x1xf32>
    %2 = arith.mulf %0, %1 : vector<2x1xf32>
    %3 = math.roundeven %2 : vector<2x1xf32>
    %cst_1 = arith.constant 0.000000e+00 : f32
    %cst_2 = arith.constant 8.000000e+00 : f32
    %4 = vector.broadcast %cst_1 : f32 to vector<2x1xf32>
    %5 = arith.maximumf %4, %3 : vector<2x1xf32>
    %6 = vector.broadcast %cst_2 : f32 to vector<2x1xf32>
    %7 = arith.minimumf %6, %5 : vector<2x1xf32>
    %8 = arith.fptosi %7 : vector<2x1xf32> to vector<2x1xi32>
    %c8_i32 = arith.constant 8 : i32
    %9 = arith.muli %arg1, %c8_i32 : i32
    %10 = tpu.iota {dimensions = array<i32: 1>} : vector<2x8xi32>
    %11 = vector.broadcast %9 : i32 to vector<2x8xi32>
    %12 = arith.addi %10, %11 : vector<2x8xi32>
    %13 = vector.broadcast %8 : vector<2x1xi32> to vector<2x8xi32>
    %14 = arith.cmpi slt, %12, %13 : vector<2x8xi32>
    %15 = arith.extui %14 : vector<2x8xi1> to vector<2x8xi32>
    %16 = arith.sitofp %15 : vector<2x8xi32> to vector<2x8xf32>
    %c0_3 = arith.constant 0 : index
    %c0_4 = arith.constant 0 : index
    %17 = vector.load %arg3[%c0_3, %c0_4] : memref<2x8xf32, #tpu.memory_space<vmem>>, vector<2x8xf32>
    tpu.vector_store %arg3[%c0_3, %c0_4], %16 {strides = array<i32>} : memref<2x8xf32, #tpu.memory_space<vmem>>, vector<2x8xf32>,
    return
  }
  func.func @transform_0(%arg0: i32, %arg1: i32) -> (i32, i32) {
    %c0_i32 = arith.constant 0 : i32
    %c0_i32_0 = arith.constant 0 : i32
    return %arg0, %c0_i32 : i32, i32
  }
  func.func @transform_1(%arg0: i32, %arg1: i32) -> (i32, i32) {
    %c0_i32 = arith.constant 0 : i32
    return %arg0, %arg1 : i32, i32
  }
}

</mosaic_0001>

<bundles_post_ra>
// kernel: tpu_custom_call.1
= control target key start
LH: loop header
LB: loop body
LE: loop exit
PB: predicated region body
PF: predicated region fallthrough
CT: control target
= control target key end

     0   :  { %s105_s0 = inlined_call_operand.vmem [shape: f32[2,1], index: 0, kind: input, shape index: {}]   ;;  %s106_s1 = inlined_call_operand.hbm [shape: f32[2,8], index: 1, kind: output, shape index: {}]  }
   0x1   :  { %v9_v0 = vld [vmem:[%s105_s0] sm:$0x3] }
   0x2   :  { %6 = vsyncpa [#allocation3], 0  ;;  %v77_v1 = vmov 0   ;;  %v10_v2 = vmul.f32 8.0, %v9_v0  ;;  %v16_v6 = vlaneseq  ;;  %s78_s8 = smov [#allocation2]   ;;  %vm26_vm0 = vcmask 58368  }
   0x3   :  { %52 = vset.pattern.permute.xlu0 %v77_v1  ;;  %s34_s9 = sshll.u32 %s78_s8, 4  ;;  %v79_v9 = vmov 0.0   ;;  %s35_s9 = int_to_ptr.vmem [resolvable:$true] %s34_s9 }
   0x4   :  { %v42_v3 = vmax.f32 %v10_v2, 0.0  ;;  %v17_v7 = vand.u32 127, %v16_v6  ;;  %s53_s0 = scalar_lea.vmem %s35_s9, 32  ;;  %p58_p1 = scmp.lt.s32.totalorder %s35_s9, %s35_s9 }
   0x5   :  { %p54_p0 = scmp.ne.s32.totalorder %s35_s9, %s53_s0  ;;  %p59_p2 = scmp.lt.s32.totalorder %s53_s0, %s53_s0 }
   0x6   :  { %v43_v4 = vmin.f32 %v42_v3, 8.0 }
   0x7   :  { %p60_p3 = por %p59_p2, %p58_p1 }
   0x8   :  { %v48_v5 = vcvt.f32.s32 %v43_v4 }
   0x9   :  { %p61_p4 = pnand %p60_p3, %p54_p0 }
   0xa   :  { %21 = vperm.xlu0 %52, %v48_v5  }
  0x89   :  { %v22_v8 = vpop.permute.xlu0 %21 }
  0x8a   :  { %vm23_vm1 = vcmp.lt.s32.totalorder %v17_v7, %v22_v8 }
  0x8b   :  { %v45_v10 = vsel %vm23_vm1, 1.0, %v79_v9 }
  0x8c   :  { %27 = vst.msk [vmem:[#allocation2] sm:$0x3] %vm26_vm0, %v45_v10 }
  0x8d   :  { %64 = shalt.err (!%p61_p4)
}
  0x8e   :  { %s65_s12 = scalar_lea.hbm %s106_s1, 32 }
  0x8f   :  { %p66_p5 = scmp.ne.s32.totalorder %s106_s1, %s65_s12  ;;  %p69_p6 = scmp.lt.u32.totalorder %s65_s12, %s106_s1 }
  0x91   :  { %p71_p7 = pnand %p69_p6, %p66_p5 }
  0x93   :  { %74 = shalt.err (!%p71_p7)
}
  0x94   :  { %37 = dma.vmem_to_hbm [thread:$0]  %s35_s9, 32, %s106_s1, [#allocation3]  }
  0x95   :  { %75 = dma.done.wait [#allocation3], 32  }
  0x96   :  { %76 = vsyncadd [#allocation3], 4294967264 }
  0x97   :  { %41 = vsyncpa [#allocation3], 1 }

</bundles_post_ra>
